<compile_context>
chip_gen: v6e
topology: v6e:2x2x1
jax: 0.10.0
libtpu: 0.0.40
codegen_flags: <defaults>
</compile_context>

<pallas_src>
import math

import jax
import jax.numpy as jnp
from jax.experimental import pallas as pl
from jax.experimental.pallas import tpu as pltpu


def _round_up(x, m):
    return ((x + m - 1) // m) * m


def _graph_conv_kernel(x_ref, s_ref, w_ref, b_ref, o_ref):
    # x_ref: (TILE_M, Cin)      streamed input tile
    # s_ref: (TILE_M, 1)        f32 per-row scale, resident (same block every step)
    # w_ref: (Cin, Cout_pad)    bf16 weight, resident
    # b_ref: (1, Cout_pad)      f32 bias, resident
    # o_ref: (TILE_M, Cout_pad) output tile
    # Scale multiply in f32 (safe on v5e's f32-only VPU), then cast for the MXU.
    xs = x_ref[...].astype(jnp.float32) * s_ref[...]
    acc = jnp.dot(xs.astype(w_ref.dtype), w_ref[...],
                  preferred_element_type=jnp.float32)           # MXU, f32 accumulation
    o_ref[...] = (acc + b_ref[...]).astype(o_ref.dtype)          # fused bias epilogue


def graph_conv_forward(x, adjacency, conv_weight, conv_bias, *,
                       tile_m_target=1024, compute_dtype=jnp.bfloat16):
    """Forward pass of GraphConv.

    x:           (B, Cin, T, V)
    adjacency:   (V, V)
    conv_weight: (Cout, Cin, 1, 1) or (Cout, Cin)   (1x1 Conv2d weight)
    conv_bias:   (Cout,)
    returns:     (B, Cout, T, V)
    """
    B, Cin, T, V = x.shape
    Cout = conv_weight.shape[0]
    out_dtype = x.dtype

    # einsum('vw,bctw->bctw', A, x) == x * A.sum(axis=0)[w]  (v is summed out).
    scale = jnp.sum(adjacency.astype(jnp.float32), axis=0)        # (V,)

    # Tokens-x-channels layout, rows ordered (b, t, v).
    n_rows = B * T * V
    x2d = jnp.transpose(x, (0, 2, 3, 1)).reshape(n_rows, Cin)

    # TILE_M: multiple of 8 (sublane) and of V (so the scale block is identical
    # for every grid step), capped by the row count / the target tile size.
    base = math.lcm(8, V)
    tile_m = max(base, (min(tile_m_target, n_rows) // base) * base)
    n_pad = _round_up(n_rows, tile_m)
    if n_pad != n_rows:
        x2d = jnp.pad(x2d, ((0, n_pad - n_rows), (0, 0)))

    # Single resident scale block (pattern repeats every V rows).
    scale_tile = jnp.tile(scale, tile_m // V).reshape(tile_m, 1)

    # 1x1 conv -> (Cin, Cout) matmul weight; pad Cout to a lane-dense multiple of 128.
    w2d = conv_weight.reshape(Cout, Cin).T                         # (Cin, Cout)
    cout_pad = _round_up(Cout, 128)
    if cout_pad != Cout:
        w2d = jnp.pad(w2d, ((0, 0), (0, cout_pad - Cout)))
        bias = jnp.pad(conv_bias, (0, cout_pad - Cout))
    else:
        bias = conv_bias
    w2d = w2d.astype(compute_dtype)                                # resident -> one-time cast
    bias2d = bias.reshape(1, cout_pad).astype(jnp.float32)

    grid = (n_pad // tile_m,)
    out2d = pl.pallas_call(
        _graph_conv_kernel,
        out_shape=jax.ShapeDtypeStruct((n_pad, cout_pad), out_dtype),
        grid_spec=pltpu.PrefetchScalarGridSpec(
            num_scalar_prefetch=0,
            grid=grid,
            in_specs=[
                pl.BlockSpec((tile_m, Cin), lambda i: (i, 0)),       # streamed X tile
                pl.BlockSpec((tile_m, 1), lambda i: (0, 0)),         # resident scale
                pl.BlockSpec((Cin, cout_pad), lambda i: (0, 0)),     # resident W
                pl.BlockSpec((1, cout_pad), lambda i: (0, 0)),       # resident bias
            ],
            out_specs=pl.BlockSpec((tile_m, cout_pad), lambda i: (i, 0)),
        ),
        compiler_params=pltpu.CompilerParams(
            dimension_semantics=("parallel",),
        ),
    )(x2d, scale_tile, w2d, bias2d)

    out = out2d[:n_rows, :Cout].reshape(B, T, V, Cout)
    return jnp.transpose(out, (0, 3, 1, 2))                         # (B, Cout, T, V)


if __name__ == "__main__":
    key = jax.random.PRNGKey(0)
    kx, ka, kw, kb = jax.random.split(key, 4)

    B, Cin, T, V, Cout = 2, 4, 8, 16, 32
    x = jax.random.normal(kx, (B, Cin, T, V), dtype=jnp.float32)
    A = jax.random.uniform(ka, (V, V), dtype=jnp.float32)
    w = jax.random.normal(kw, (Cout, Cin, 1, 1), dtype=jnp.float32) * 0.1
    b = jax.random.normal(kb, (Cout,), dtype=jnp.float32) * 0.1

    out = graph_conv_forward(x, A, w, b)
    out = jax.block_until_ready(out)

    # Pure-JAX f32 reference (matches the PyTorch module).
    scale = A.sum(axis=0)                                           # (V,)
    x_scaled = x * scale[None, None, None, :]
    ref = jnp.einsum("bctv,oc->botv", x_scaled, w.reshape(Cout, Cin)) \
        + b[None, :, None, None]

    assert out.shape == (B, Cout, T, V)
    max_err = float(jnp.max(jnp.abs(out - ref)))
    assert max_err < 5e-2, f"max abs err too large: {max_err}"      # bf16 MXU, f32 accumulation
    print("KERNEL_OK")
</pallas_src>

<mosaic_0001>
module attributes {stable_mosaic.version = 11 : i64} {
  func.func @_graph_conv_kernel(%arg0: i32, %arg1: memref<256x4xf32, #tpu.memory_space<vmem>>, %arg2: memref<256x1xf32, #tpu.memory_space<vmem>>, %arg3: memref<4x128xbf16, #tpu.memory_space<vmem>>, %arg4: memref<1x128xf32, #tpu.memory_space<vmem>>, %arg5: memref<256x128xf32, #tpu.memory_space<vmem>>) attributes {dimension_semantics = [#tpu.dimension_semantics<parallel>], iteration_bounds = array<i64: 1>, scalar_prefetch = 0 : i64, scratch_operands = 0 : i64, tpu.core_type = #tpu.core_type<tc>, window_params = [{transform_indices = @transform_0, window_bounds = array<i64: 256, 4>}, {pipeline_mode = #tpu.pipeline_mode<synchronous>, transform_indices = @transform_1, window_bounds = array<i64: 256, 1>}, {pipeline_mode = #tpu.pipeline_mode<synchronous>, transform_indices = @transform_2, window_bounds = array<i64: 4, 128>}, {pipeline_mode = #tpu.pipeline_mode<synchronous>, transform_indices = @transform_3, window_bounds = array<i64: 1, 128>}, {transform_indices = @transform_4, window_bounds = array<i64: 256, 128>}]} {
    %c0 = arith.constant 0 : index
    %c0_0 = arith.constant 0 : index
    %0 = vector.load %arg1[%c0, %c0_0] : memref<256x4xf32, #tpu.memory_space<vmem>>, vector<256x4xf32>
    %c0_1 = arith.constant 0 : index
    %c0_2 = arith.constant 0 : index
    %1 = vector.load %arg2[%c0_1, %c0_2] : memref<256x1xf32, #tpu.memory_space<vmem>>, vector<256x1xf32>
    %2 = vector.broadcast %1 : vector<256x1xf32> to vector<256x4xf32>
    %3 = arith.mulf %0, %2 : vector<256x4xf32>
    %4 = arith.truncf %3 : vector<256x4xf32> to vector<256x4xbf16>
    %c0_3 = arith.constant 0 : index
    %c0_4 = arith.constant 0 : index
    %5 = vector.load %arg3[%c0_3, %c0_4] : memref<4x128xbf16, #tpu.memory_space<vmem>>, vector<4x128xbf16>
    %cst = arith.constant dense<0.000000e+00> : vector<256x128xf32>
    %6 = tpu.matmul %4, %5, %cst {dimension_numbers = #tpu.dot_dimension_numbers<[1], [0], [0], [1], [0, 0, 1, 1], [], []>} : vector<256x4xbf16>, vector<4x128xbf16>, vector<256x128xf32> -> vector<256x128xf32>
    %c0_5 = arith.constant 0 : index
    %c0_6 = arith.constant 0 : index
    %7 = vector.load %arg4[%c0_5, %c0_6] : memref<1x128xf32, #tpu.memory_space<vmem>>, vector<1x128xf32>
    %8 = vector.broadcast %7 : vector<1x128xf32> to vector<256x128xf32>
    %9 = arith.addf %6, %8 : vector<256x128xf32>
    %c0_7 = arith.constant 0 : index
    %c0_8 = arith.constant 0 : index
    %10 = vector.load %arg5[%c0_7, %c0_8] : memref<256x128xf32, #tpu.memory_space<vmem>>, vector<256x128xf32>
    tpu.vector_store %arg5[%c0_7, %c0_8], %9 {strides = array<i32>} : memref<256x128xf32, #tpu.memory_space<vmem>>, vector<256x128xf32>,
    return
  }
  func.func @transform_0(%arg0: i32) -> (i32, i32) {
    %c0_i32 = arith.constant 0 : i32
    %c0_i32_0 = arith.constant 0 : i32
    return %arg0, %c0_i32 : i32, i32
  }
  func.func @transform_1(%arg0: i32) -> (i32, i32) {
    %c0_i32 = arith.constant 0 : i32
    %c0_i32_0 = arith.constant 0 : i32
    %c0_i32_1 = arith.constant 0 : i32
    return %c0_i32, %c0_i32_0 : i32, i32
  }
  func.func @transform_2(%arg0: i32) -> (i32, i32) {
    %c0_i32 = arith.constant 0 : i32
    %c0_i32_0 = arith.constant 0 : i32
    %c0_i32_1 = arith.constant 0 : i32
    return %c0_i32, %c0_i32_0 : i32, i32
  }
  func.func @transform_3(%arg0: i32) -> (i32, i32) {
    %c0_i32 = arith.constant 0 : i32
    %c0_i32_0 = arith.constant 0 : i32
    %c0_i32_1 = arith.constant 0 : i32
    return %c0_i32, %c0_i32_0 : i32, i32
  }
  func.func @transform_4(%arg0: i32) -> (i32, i32) {
    %c0_i32 = arith.constant 0 : i32
    %c0_i32_0 = arith.constant 0 : i32
    return %arg0, %c0_i32 : i32, i32
  }
}

</mosaic_0001>

<bundles_post_ra>
// kernel: tpu_custom_call.1
= control target key start
LH: loop header
LB: loop body
LE: loop exit
PB: predicated region body
PF: predicated region fallthrough
CT: control target
= control target key end

     0   :  { %v661_v2 = vmov 0   ;;  %vm348_vm0 = vcmask 1041408   ;;  %s941_s0 = inlined_call_operand.vmem [shape: f32[256,4], index: 0, kind: input, shape index: {}]   ;;  %s942_s1 = inlined_call_operand.vmem [shape: f32[256,1], index: 1, kind: input, shape index: {}]   ;;  %s943_s2 = inlined_call_operand.vmem [shape: bf16[4,128], index: 2, kind: input, shape index: {}]   ;;  %s944_s3 = inlined_call_operand.vmem [shape: f32[1,128], index: 3, kind: input, shape index: {}]   ;;  %s945_s4 = inlined_call_operand.hbm [shape: f32[256,128], index: 4, kind: output, shape index: {}]  }
   0x1   :  { %v67_v0 = vld [vmem:[%s942_s1 + $0x80] sm:$0xff]  ;;  %638 = vset.pattern.permute.xlu1 %v661_v2  ;;  %637 = vset.pattern.permute.xlu0 %v661_v2  ;;  %v68_v3 = vld [vmem:[%s942_s1 + $0x88] sm:$0xff]  ;;  %v54_v5 = vld [vmem:[%s942_s1 + $0x18] sm:$0xff] }
   0x2   :  { %v51_v1 = vld [vmem:[%s942_s1] sm:$0xff]  ;;  %165 = vperm.xlu1 %638, %v67_v0   ;;  %v52_v4 = vld [vmem:[%s942_s1 + $0x8] sm:$0xff]  ;;  %v53_v6 = vld [vmem:[%s942_s1 + $0x10] sm:$0xff] }
   0x3   :  { %85 = vperm.xlu0 %637, %v51_v1   ;;  %v70_v7 = vld [vmem:[%s942_s1 + $0x98] sm:$0xff]  ;;  %v69_v8 = vld [vmem:[%s942_s1 + $0x90] sm:$0xff]  ;;  %v291_v9 = vld [vmem:[%s943_s2] sm:$0x3] }
   0x4   :  { %631 = vmatprep.subr.msk.bf16.mxu0 %vm348_vm0, %v291_v9  ;;  %v350_v10 = vsel %vm348_vm0, %v291_v9, 0  ;;  %632 = vmatprep.subr.msk.bf16.mxu1 %vm348_vm0, %v291_v9 }
   0x6   :  { %170 = vperm.xlu1 %638, %v68_v3  }
   0x7   :  { %90 = vperm.xlu0 %637, %v52_v4  }
   0xa   :  { %100 = vperm.xlu1 %638, %v54_v5  }
   0xb   :  { %95 = vperm.xlu0 %637, %v53_v6  }
   0xe   :  { %180 = vperm.xlu1 %638, %v70_v7  }
   0xf   :  { %175 = vperm.xlu0 %637, %v69_v8  }
  0x10   :  { %9 = vsyncpa [#allocation3], 0  ;;  %v56_v11 = vld [vmem:[%s942_s1 + $0x28] sm:$0xff]  ;;  %v55_v12 = vld [vmem:[%s942_s1 + $0x20] sm:$0xff]  ;;  %596 = vmatpush3.bf16.msra.mxu0 %v350_v10  ;;  %630 = vmatpush3.bf16.msra.mxu1 %v350_v10  ;;  %vm299_vm1 = vcmask 31744  }
  0x11   :  { %v72_v13 = vld [vmem:[%s942_s1 + $0xa8] sm:$0xff]  ;;  %v71_v14 = vld [vmem:[%s942_s1 + $0xa0] sm:$0xff]  ;;  %v58_v15 = vld [vmem:[%s942_s1 + $0x38] sm:$0xff] }
  0x12   :  { %110 = vperm.xlu1 %638, %v56_v11   ;;  %v57_v16 = vld [vmem:[%s942_s1 + $0x30] sm:$0xff]  ;;  %v74_v17 = vld [vmem:[%s942_s1 + $0xb8] sm:$0xff]  ;;  %v60_v19 = vld [vmem:[%s942_s1 + $0x48] sm:$0xff] }
  0x13   :  { %105 = vperm.xlu0 %637, %v55_v12   ;;  %v73_v18 = vld [vmem:[%s942_s1 + $0xb0] sm:$0xff]  ;;  %v59_v20 = vld [vmem:[%s942_s1 + $0x40] sm:$0xff]  ;;  %v76_v21 = vld [vmem:[%s942_s1 + $0xc8] sm:$0xff] }
  0x14   :  { %v75_v22 = vld [vmem:[%s942_s1 + $0xc0] sm:$0xff]  ;;  %v62_v23 = vld [vmem:[%s942_s1 + $0x58] sm:$0xff]  ;;  %v61_v24 = vld [vmem:[%s942_s1 + $0x50] sm:$0xff] }
  0x15   :  { %v78_v25 = vld [vmem:[%s942_s1 + $0xd8] sm:$0xff]  ;;  %v77_v26 = vld [vmem:[%s942_s1 + $0xd0] sm:$0xff]  ;;  %v64_v27 = vld [vmem:[%s942_s1 + $0x68] sm:$0xff] }
  0x16   :  { %190 = vperm.xlu1 %638, %v72_v13   ;;  %v63_v28 = vld [vmem:[%s942_s1 + $0x60] sm:$0xff]  ;;  %v80_v29 = vld [vmem:[%s942_s1 + $0xe8] sm:$0xff]  ;;  %v66_v31 = vld [vmem:[%s942_s1 + $0x78] sm:$0xff] }
  0x17   :  { %185 = vperm.xlu0 %637, %v71_v14   ;;  %v79_v30 = vld [vmem:[%s942_s1 + $0xe0] sm:$0xff]  ;;  %v65_v32 = vld [vmem:[%s942_s1 + $0x70] sm:$0xff]  ;;  %v82_v33 = vld [vmem:[%s942_s1 + $0xf8] sm:$0xff] }
  0x18   :  { %v81_v34 = vld [vmem:[%s942_s1 + $0xf0] sm:$0xff]  ;;  %v35_v37 = vld [vmem:[%s941_s0 + $0x80] sm:$0xff]  ;;  %v36_v39 = vld [vmem:[%s941_s0 + $0x88] sm:$0xff] }
  0x19   :  { %v19_v38 = vld [vmem:[%s941_s0] sm:$0xff]  ;;  %v20_v40 = vld [vmem:[%s941_s0 + $0x8] sm:$0xff]  ;;  %v22_v47 = vld [vmem:[%s941_s0 + $0x18] sm:$0xff] }
  0x1a   :  { %120 = vperm.xlu1 %638, %v58_v15   ;;  %v21_v48 = vld [vmem:[%s941_s0 + $0x10] sm:$0xff]  ;;  %v38_v55 = vld [vmem:[%s941_s0 + $0x98] sm:$0xff]  ;;  %v24_v62 = vld [vmem:[%s941_s0 + $0x28] sm:$0xff] }
  0x1b   :  { %115 = vperm.xlu0 %637, %v57_v16   ;;  %v37_v56 = vld [vmem:[%s941_s0 + $0x90] sm:$0xff]  ;;  %v23_v63 = vld [vmem:[%s941_s0 + $0x20] sm:$0xff]  ;;  %v40_v5 = vld [vmem:[%s941_s0 + $0xa8] sm:$0xff] }
  0x1c   :  { %v39_v6 = vld [vmem:[%s941_s0 + $0xa0] sm:$0xff]  ;;  %v26_v12 = vld [vmem:[%s941_s0 + $0x38] sm:$0xff]  ;;  %v25_v13 = vld [vmem:[%s941_s0 + $0x30] sm:$0xff] }
  0x1e   :  { %200 = vperm.xlu1 %638, %v74_v17  }
  0x1f   :  { %195 = vperm.xlu0 %637, %v73_v18  }
  0x22   :  { %130 = vperm.xlu1 %638, %v60_v19   ;;  %v42_v19 = vld [vmem:[%s941_s0 + $0xb8] sm:$0xff] }
  0x23   :  { %125 = vperm.xlu0 %637, %v59_v20   ;;  %v41_v20 = vld [vmem:[%s941_s0 + $0xb0] sm:$0xff] }
  0x26   :  { %210 = vperm.xlu1 %638, %v76_v21  }
  0x27   :  { %205 = vperm.xlu0 %637, %v75_v22  }
  0x2a   :  { %140 = vperm.xlu1 %638, %v62_v23  }
  0x2b   :  { %135 = vperm.xlu0 %637, %v61_v24  }
  0x2e   :  { %220 = vperm.xlu1 %638, %v78_v25  }
  0x2f   :  { %215 = vperm.xlu0 %637, %v77_v26   ;;  %v28_v26 = vld [vmem:[%s941_s0 + $0x48] sm:$0xff] }
  0x32   :  { %150 = vperm.xlu1 %638, %v64_v27   ;;  %v27_v27 = vld [vmem:[%s941_s0 + $0x40] sm:$0xff] }
  0x33   :  { %145 = vperm.xlu0 %637, %v63_v28  }
  0x36   :  { %230 = vperm.xlu1 %638, %v80_v29  }
  0x37   :  { %225 = vperm.xlu0 %637, %v79_v30  }
  0x3a   :  { %160 = vperm.xlu1 %638, %v66_v31  }
  0x3b   :  { %155 = vperm.xlu0 %637, %v65_v32  }
  0x3e   :  { %240 = vperm.xlu1 %638, %v82_v33   ;;  %v44_v33 = vld [vmem:[%s941_s0 + $0xc8] sm:$0xff] }
  0x3f   :  { %235 = vperm.xlu0 %637, %v81_v34   ;;  %v43_v34 = vld [vmem:[%s941_s0 + $0xc0] sm:$0xff] }
  0x7d   :  { %v166_v35 = vpop.permute.xlu1 %165 }
  0x7e   :  { %v86_v36 = vpop.permute.xlu0 %85  ;;  %v259_v43 = vmul.f32 %v166_v35, %v35_v37 }
  0x7f   :  { %v243_v44 = vmul.f32 %v86_v36, %v19_v38 }
  0x81   :  { %v171_v41 = vpop.permute.xlu1 %170 }
  0x82   :  { %v91_v42 = vpop.permute.xlu0 %90  ;;  %v260_v45 = vmul.f32 %v171_v41, %v36_v39  ;;  %v29_v41 = vld [vmem:[%s941_s0 + $0x50] sm:$0xff] }
  0x83   :  { %v244_v46 = vmul.f32 %v91_v42, %v20_v40  ;;  %v30_v40 = vld [vmem:[%s941_s0 + $0x58] sm:$0xff] }
  0x84   :  { %v283_v50 = vpack.c.bf16 %v260_v45, %v259_v43 }
  0x85   :  { %v275_v49 = vpack.c.bf16 %v244_v46, %v243_v44  ;;  %v101_v51 = vpop.permute.xlu1 %100 }
  0x86   :  { %v96_v52 = vpop.permute.xlu0 %95  ;;  %v246_v53 = vmul.f32 %v101_v51, %v22_v47  ;;  %613 = vmatprep.mubr.msk.bf16.mxu1 %vm299_vm1, %v283_v50  ;;  %v46_v47 = vld [vmem:[%s941_s0 + $0xd8] sm:$0xff] }
  0x87   :  { %v245_v54 = vmul.f32 %v96_v52, %v21_v48  ;;  %597 = vmatprep.mubr.msk.bf16.mxu0 %vm299_vm1, %v275_v49  ;;  %v45_v48 = vld [vmem:[%s941_s0 + $0xd0] sm:$0xff] }
  0x89   :  { %v276_v57 = vpack.c.bf16 %v246_v53, %v245_v54  ;;  %v181_v58 = vpop.permute.xlu1 %180  ;;  %v32_v54 = vld [vmem:[%s941_s0 + $0x68] sm:$0xff] }
  0x8a   :  { %v176_v59 = vpop.permute.xlu0 %175  ;;  %v262_v60 = vmul.f32 %v181_v58, %v38_v55  ;;  %v31_v55 = vld [vmem:[%s941_s0 + $0x60] sm:$0xff] }
  0x8b   :  { %v261_v61 = vmul.f32 %v176_v59, %v37_v56  ;;  %598 = vmatmul.mubr.msk.bf16.vlgmr.msra.gmra.mxu0 %vm299_vm1, %v276_v57 }
  0x8d   :  { %v284_v0 = vpack.c.bf16 %v262_v60, %v261_v61  ;;  %v111_v1 = vpop.permute.xlu1 %110  ;;  %v48_v61 = vld [vmem:[%s941_s0 + $0xe8] sm:$0xff] }
  0x8e   :  { %v106_v2 = vpop.permute.xlu0 %105  ;;  %v248_v3 = vmul.f32 %v111_v1, %v24_v62  ;;  %v47_v62 = vld [vmem:[%s941_s0 + $0xe0] sm:$0xff] }
  0x8f   :  { %v247_v4 = vmul.f32 %v106_v2, %v23_v63  ;;  %614 = vmatmul.mubr.msk.bf16.vlgmr.msra.gmra.mxu1 %vm299_vm1, %v284_v0 }
  0x91   :  { %v277_v7 = vpack.c.bf16 %v248_v3, %v247_v4  ;;  %v191_v8 = vpop.permute.xlu1 %190  ;;  %v34_v4 = vld [vmem:[%s941_s0 + $0x78] sm:$0xff] }
  0x92   :  { %v186_v9 = vpop.permute.xlu0 %185  ;;  %v264_v10 = vmul.f32 %v191_v8, %v40_v5  ;;  %v33_v5 = vld [vmem:[%s941_s0 + $0x70] sm:$0xff] }
  0x93   :  { %v263_v11 = vmul.f32 %v186_v9, %v39_v6  ;;  %601 = vmatprep.mubr.msk.bf16.mxu0 %vm299_vm1, %v277_v7 }
  0x95   :  { %v285_v14 = vpack.c.bf16 %v264_v10, %v263_v11  ;;  %v121_v15 = vpop.permute.xlu1 %120  ;;  %v50_v11 = vld [vmem:[%s941_s0 + $0xf8] sm:$0xff] }
  0x96   :  { %v116_v16 = vpop.permute.xlu0 %115  ;;  %v250_v17 = vmul.f32 %v121_v15, %v26_v12  ;;  %v49_v12 = vld [vmem:[%s941_s0 + $0xf0] sm:$0xff]  ;;  %s662_s0 = smov [#allocation2]  }
  0x97   :  { %v249_v18 = vmul.f32 %v116_v16, %v25_v13  ;;  %617 = vmatprep.mubr.msk.bf16.mxu1 %vm299_vm1, %v285_v14 }
  0x99   :  { %v278_v21 = vpack.c.bf16 %v250_v17, %v249_v18  ;;  %v201_v22 = vpop.permute.xlu1 %200 }
  0x9a   :  { %v196_v23 = vpop.permute.xlu0 %195  ;;  %v266_v24 = vmul.f32 %v201_v22, %v42_v19  ;;  %v904_v19 = vld [vmem:[%s944_s3] ss:$0 sm:$0xff]  ;;  %s550_s3 = sshll.u32 %s662_s0, 4  ;;  %s551_s3 = int_to_ptr.vmem [resolvable:$true] %s550_s3 }
  0x9b   :  { %v265_v25 = vmul.f32 %v196_v23, %v41_v20  ;;  %602 = vmatmul.mubr.msk.bf16.gmra.mxu0 %vm299_vm1, %v278_v21  ;;  %s639_s10 = scalar_lea.vmem %s551_s3, 4096  ;;  %p644_p1 = scmp.lt.s32.totalorder %s551_s3, %s551_s3 }
  0x9c   :  { %p640_p0 = scmp.ne.s32.totalorder %s551_s3, %s639_s10  ;;  %p645_p2 = scmp.lt.s32.totalorder %s639_s10, %s639_s10 }
  0x9d   :  { %v286_v28 = vpack.c.bf16 %v266_v24, %v265_v25  ;;  %v131_v29 = vpop.permute.xlu1 %130 }
  0x9e   :  { %v126_v30 = vpop.permute.xlu0 %125  ;;  %v252_v31 = vmul.f32 %v131_v29, %v28_v26  ;;  %p646_p3 = por %p645_p2, %p644_p1 }
  0x9f   :  { %v251_v32 = vmul.f32 %v126_v30, %v27_v27  ;;  %618 = vmatmul.mubr.msk.bf16.gmra.mxu1 %vm299_vm1, %v286_v28 }
  0xa0   :  { %p647_p4 = pnand %p646_p3, %p640_p0 }
  0xa1   :  { %v279_v35 = vpack.c.bf16 %v252_v31, %v251_v32  ;;  %v211_v36 = vpop.permute.xlu1 %210 }
  0xa2   :  { %v206_v37 = vpop.permute.xlu0 %205  ;;  %v268_v38 = vmul.f32 %v211_v36, %v44_v33 }
  0xa3   :  { %v267_v39 = vmul.f32 %v206_v37, %v43_v34  ;;  %605 = vmatprep.mubr.msk.bf16.mxu0 %vm299_vm1, %v279_v35 }
  0xa5   :  { %v287_v42 = vpack.c.bf16 %v268_v38, %v267_v39  ;;  %v141_v43 = vpop.permute.xlu1 %140 }
  0xa6   :  { %v136_v44 = vpop.permute.xlu0 %135  ;;  %v254_v45 = vmul.f32 %v141_v43, %v30_v40 }
  0xa7   :  { %v253_v46 = vmul.f32 %v136_v44, %v29_v41  ;;  %621 = vmatprep.mubr.msk.bf16.mxu1 %vm299_vm1, %v287_v42 }
  0xa9   :  { %v280_v49 = vpack.c.bf16 %v254_v45, %v253_v46  ;;  %v221_v50 = vpop.permute.xlu1 %220 }
  0xaa   :  { %v216_v51 = vpop.permute.xlu0 %215  ;;  %v270_v52 = vmul.f32 %v221_v50, %v46_v47 }
  0xab   :  { %v269_v53 = vmul.f32 %v216_v51, %v45_v48  ;;  %606 = vmatmul.mubr.msk.bf16.gmra.mxu0 %vm299_vm1, %v280_v49 }
  0xad   :  { %v288_v56 = vpack.c.bf16 %v270_v52, %v269_v53  ;;  %v151_v57 = vpop.permute.xlu1 %150 }
  0xae   :  { %v146_v58 = vpop.permute.xlu0 %145  ;;  %v256_v59 = vmul.f32 %v151_v57, %v32_v54 }
  0xaf   :  { %v255_v60 = vmul.f32 %v146_v58, %v31_v55  ;;  %622 = vmatmul.mubr.msk.bf16.gmra.mxu1 %vm299_vm1, %v288_v56 }
  0xb1   :  { %v281_v63 = vpack.c.bf16 %v256_v59, %v255_v60  ;;  %v231_v0 = vpop.permute.xlu1 %230 }
  0xb2   :  { %v226_v1 = vpop.permute.xlu0 %225  ;;  %v272_v2 = vmul.f32 %v231_v0, %v48_v61 }
  0xb3   :  { %v271_v3 = vmul.f32 %v226_v1, %v47_v62  ;;  %609 = vmatprep.mubr.msk.bf16.mxu0 %vm299_vm1, %v281_v63 }
  0xb5   :  { %v289_v6 = vpack.c.bf16 %v272_v2, %v271_v3  ;;  %v161_v7 = vpop.permute.xlu1 %160 }
  0xb6   :  { %v156_v8 = vpop.permute.xlu0 %155  ;;  %v258_v9 = vmul.f32 %v161_v7, %v34_v4 }
  0xb7   :  { %v257_v10 = vmul.f32 %v156_v8, %v33_v5  ;;  %625 = vmatprep.mubr.msk.bf16.mxu1 %vm299_vm1, %v289_v6 }
  0xb9   :  { %v282_v13 = vpack.c.bf16 %v258_v9, %v257_v10  ;;  %v241_v14 = vpop.permute.xlu1 %240 }
  0xba   :  { %v236_v15 = vpop.permute.xlu0 %235  ;;  %v274_v16 = vmul.f32 %v241_v14, %v50_v11 }
  0xbb   :  { %v273_v17 = vmul.f32 %v236_v15, %v49_v12  ;;  %610 = vmatmul.mubr.msk.bf16.gmra.mxu0 %vm299_vm1, %v282_v13 }
  0xbd   :  { %v290_v18 = vpack.c.bf16 %v274_v16, %v273_v17 }
  0xbf   :  { %626 = vmatmul.mubr.msk.bf16.gmra.mxu1 %vm299_vm1, %v290_v18 }
 0x14b   :  { %v599_v20 = vpop.f32.mrf.mxu0 }
 0x14c   :  { %v395_v21 = vadd.f32 %v599_v20, %v904_v19 }
 0x14d   :  { %v386_v22 = vpop.f32.mrf.mxu0 }
 0x14e   :  { %515 = vst [vmem:[#allocation2 + $0x10] sm:$0xff] %v395_v21  ;;  %v387_v23 = vadd.f32 %v904_v19, %v386_v22 }
 0x14f   :  { %v600_v24 = vpop.f32.mrf.mxu0  ;;  %v615_v25 = vpop.f32.mrf.mxu1 }
 0x150   :  { %513 = vst [vmem:[#allocation2] sm:$0xff] %v387_v23  ;;  %v398_v26 = vadd.f32 %v600_v24, %v904_v19  ;;  %v459_v27 = vadd.f32 %v615_v25, %v904_v19 }
 0x151   :  { %v389_v28 = vpop.f32.mrf.mxu0  ;;  %v450_v29 = vpop.f32.mrf.mxu1 }
 0x152   :  { %516 = vst [vmem:[#allocation2 + $0x18] sm:$0xff] %v398_v26  ;;  %531 = vst [vmem:[#allocation2 + $0x90] sm:$0xff] %v459_v27  ;;  %v390_v30 = vadd.f32 %v904_v19, %v389_v28  ;;  %v451_v31 = vadd.f32 %v904_v19, %v450_v29 }
 0x153   :  { %v616_v32 = vpop.f32.mrf.mxu1 }
 0x154   :  { %514 = vst [vmem:[#allocation2 + $0x8] sm:$0xff] %v390_v30  ;;  %529 = vst [vmem:[#allocation2 + $0x80] sm:$0xff] %v451_v31  ;;  %v462_v33 = vadd.f32 %v616_v32, %v904_v19 }
 0x155   :  { %v453_v34 = vpop.f32.mrf.mxu1 }
 0x156   :  { %532 = vst [vmem:[#allocation2 + $0x98] sm:$0xff] %v462_v33  ;;  %v454_v35 = vadd.f32 %v904_v19, %v453_v34 }
 0x158   :  { %530 = vst [vmem:[#allocation2 + $0x88] sm:$0xff] %v454_v35 }
 0x15b   :  { %v603_v36 = vpop.f32.mrf.mxu0 }
 0x15c   :  { %v411_v37 = vadd.f32 %v603_v36, %v904_v19 }
 0x15d   :  { %v402_v38 = vpop.f32.mrf.mxu0 }
 0x15e   :  { %519 = vst [vmem:[#allocation2 + $0x30] sm:$0xff] %v411_v37  ;;  %v403_v39 = vadd.f32 %v904_v19, %v402_v38 }
 0x15f   :  { %v604_v40 = vpop.f32.mrf.mxu0  ;;  %v619_v41 = vpop.f32.mrf.mxu1 }
 0x160   :  { %517 = vst [vmem:[#allocation2 + $0x20] sm:$0xff] %v403_v39  ;;  %v414_v42 = vadd.f32 %v604_v40, %v904_v19  ;;  %v475_v43 = vadd.f32 %v619_v41, %v904_v19 }
 0x161   :  { %v405_v44 = vpop.f32.mrf.mxu0  ;;  %v466_v45 = vpop.f32.mrf.mxu1 }
 0x162   :  { %520 = vst [vmem:[#allocation2 + $0x38] sm:$0xff] %v414_v42  ;;  %535 = vst [vmem:[#allocation2 + $0xb0] sm:$0xff] %v475_v43  ;;  %v406_v46 = vadd.f32 %v904_v19, %v405_v44  ;;  %v467_v47 = vadd.f32 %v904_v19, %v466_v45 }
 0x163   :  { %v620_v48 = vpop.f32.mrf.mxu1 }
 0x164   :  { %518 = vst [vmem:[#allocation2 + $0x28] sm:$0xff] %v406_v46  ;;  %533 = vst [vmem:[#allocation2 + $0xa0] sm:$0xff] %v467_v47  ;;  %v478_v49 = vadd.f32 %v620_v48, %v904_v19 }
 0x165   :  { %v469_v50 = vpop.f32.mrf.mxu1 }
 0x166   :  { %536 = vst [vmem:[#allocation2 + $0xb8] sm:$0xff] %v478_v49  ;;  %v470_v51 = vadd.f32 %v904_v19, %v469_v50 }
 0x168   :  { %534 = vst [vmem:[#allocation2 + $0xa8] sm:$0xff] %v470_v51 }
 0x16b   :  { %v607_v52 = vpop.f32.mrf.mxu0 }
 0x16c   :  { %v427_v53 = vadd.f32 %v607_v52, %v904_v19 }
 0x16d   :  { %v418_v54 = vpop.f32.mrf.mxu0 }
 0x16e   :  { %523 = vst [vmem:[#allocation2 + $0x50] sm:$0xff] %v427_v53  ;;  %v419_v55 = vadd.f32 %v904_v19, %v418_v54 }
 0x16f   :  { %v608_v56 = vpop.f32.mrf.mxu0  ;;  %v623_v57 = vpop.f32.mrf.mxu1 }
 0x170   :  { %521 = vst [vmem:[#allocation2 + $0x40] sm:$0xff] %v419_v55  ;;  %v430_v58 = vadd.f32 %v608_v56, %v904_v19  ;;  %v491_v59 = vadd.f32 %v623_v57, %v904_v19 }
 0x171   :  { %v421_v60 = vpop.f32.mrf.mxu0  ;;  %v482_v61 = vpop.f32.mrf.mxu1 }
 0x172   :  { %524 = vst [vmem:[#allocation2 + $0x58] sm:$0xff] %v430_v58  ;;  %539 = vst [vmem:[#allocation2 + $0xd0] sm:$0xff] %v491_v59  ;;  %v422_v62 = vadd.f32 %v904_v19, %v421_v60  ;;  %v483_v63 = vadd.f32 %v904_v19, %v482_v61 }
 0x173   :  { %v624_v0 = vpop.f32.mrf.mxu1 }
 0x174   :  { %522 = vst [vmem:[#allocation2 + $0x48] sm:$0xff] %v422_v62  ;;  %537 = vst [vmem:[#allocation2 + $0xc0] sm:$0xff] %v483_v63  ;;  %v494_v1 = vadd.f32 %v624_v0, %v904_v19 }
 0x175   :  { %v485_v2 = vpop.f32.mrf.mxu1 }
 0x176   :  { %540 = vst [vmem:[#allocation2 + $0xd8] sm:$0xff] %v494_v1  ;;  %v486_v3 = vadd.f32 %v904_v19, %v485_v2 }
 0x178   :  { %538 = vst [vmem:[#allocation2 + $0xc8] sm:$0xff] %v486_v3 }
 0x17b   :  { %v611_v4 = vpop.f32.mrf.mxu0 }
 0x17c   :  { %v443_v5 = vadd.f32 %v611_v4, %v904_v19 }
 0x17d   :  { %v434_v6 = vpop.f32.mrf.mxu0 }
 0x17e   :  { %527 = vst [vmem:[#allocation2 + $0x70] sm:$0xff] %v443_v5  ;;  %v435_v7 = vadd.f32 %v904_v19, %v434_v6 }
 0x17f   :  { %v612_v8 = vpop.f32.mrf.mxu0  ;;  %v627_v9 = vpop.f32.mrf.mxu1 }
 0x180   :  { %525 = vst [vmem:[#allocation2 + $0x60] sm:$0xff] %v435_v7  ;;  %v446_v10 = vadd.f32 %v612_v8, %v904_v19  ;;  %v507_v11 = vadd.f32 %v627_v9, %v904_v19 }
 0x181   :  { %v437_v12 = vpop.f32.mrf.mxu0  ;;  %v498_v13 = vpop.f32.mrf.mxu1 }
 0x182   :  { %528 = vst [vmem:[#allocation2 + $0x78] sm:$0xff] %v446_v10  ;;  %543 = vst [vmem:[#allocation2 + $0xf0] sm:$0xff] %v507_v11  ;;  %v438_v14 = vadd.f32 %v904_v19, %v437_v12  ;;  %v499_v15 = vadd.f32 %v904_v19, %v498_v13 }
 0x183   :  { %v628_v16 = vpop.f32.mrf.mxu1 }
 0x184   :  { %526 = vst [vmem:[#allocation2 + $0x68] sm:$0xff] %v438_v14  ;;  %541 = vst [vmem:[#allocation2 + $0xe0] sm:$0xff] %v499_v15  ;;  %v510_v17 = vadd.f32 %v628_v16, %v904_v19 }
 0x185   :  { %v501_v18 = vpop.f32.mrf.mxu1 }
 0x186   :  { %544 = vst [vmem:[#allocation2 + $0xf8] sm:$0xff] %v510_v17  ;;  %v502_v20 = vadd.f32 %v904_v19, %v501_v18 }
 0x188   :  { %542 = vst [vmem:[#allocation2 + $0xe8] sm:$0xff] %v502_v20 }
 0x189   :  { %650 = shalt.err (!%p647_p4)
}
 0x18a   :  { %s663_s11 = smov 128   ;;  %s664_s2 = smov 8  }
 0x18b   :  { %556 = dma.vmem_to_hbm [thread:$0]  %s551_s3, 4096, %s945_s4, [#allocation3], %s663_s11, %s663_s11, %s664_s2  }
 0x18c   :  { %659 = dma.done.wait [#allocation3], 4096  }
 0x18d   :  { %660 = vsyncadd [#allocation3], 4294963200 }
 0x18e   :  { %560 = vsyncpa [#allocation3], 1 }

</bundles_post_ra>
